<compile_context>
chip_gen: v5e
topology: v5e:2x2
jax: 0.10.0
libtpu: 0.0.40
codegen_flags: <defaults>
</compile_context>

<pallas_src>
import jax
import jax.numpy as jnp
from jax import lax
from jax.experimental import pallas as pl
from jax.experimental.pallas import tpu as pltpu

ALPHA = 1.0
GAMMA = 2.0           # gamma == 2 -> computed as an explicit square in-kernel
LOG_CLAMP = -100.0    # matches torch.nn.functional.binary_cross_entropy log clamp
_LANES = 128
_SUBLANES = 8


def _round_up(a, b):
    return ((a + b - 1) // b) * b


def _min_tile_rows(dtype):
    """Minimum sublane multiple for a dtype's native (rows, 128) tile."""
    size = jnp.dtype(dtype).itemsize
    if size >= 4:
        return 8
    if size == 2:
        return 16
    return 32


def _make_kernel(tile_rows, chunk_rows, rows_total, num_blocks, last_ragged):
    n_chunks = tile_rows // chunk_rows
    n_sub = chunk_rows // _SUBLANES

    def chunk_loss(x_raw, t_raw, row_base, masked):
        x = x_raw.astype(jnp.float32)
        t = t_raw.astype(jnp.float32)
        if masked:
            # Mask garbage rows of the ragged last block on the INPUTS, before the
            # logs: x=1, t=1 contributes exactly zero focal loss (no NaN poisoning).
            row = lax.broadcasted_iota(jnp.int32, (chunk_rows, _LANES), 0)
            valid = (row + row_base) < rows_total
            x = jnp.where(valid, x, 1.0)
            t = jnp.where(valid, t, 1.0)
        # binary_cross_entropy(reduce=False) with PyTorch's -100 log clamp.
        log_p = jnp.maximum(jnp.log(x), LOG_CLAMP)
        log_1mp = jnp.maximum(jnp.log(1.0 - x), LOG_CLAMP)
        bce = -(t * log_p + (1.0 - t) * log_1mp)
        pt = jnp.exp(-bce)
        d = 1.0 - pt
        return ALPHA * (d * d) * bce          # (1 - pt) ** 2 without pow's log/exp

    def add_partial(f, acc):
        # Fold (chunk_rows, 128) into the (8, 128) running sum: static vreg-sized
        # slices + VPU adds only (no reshape, no cross-lane reduce).
        for s in range(n_sub):
            acc = acc + f[s * _SUBLANES:(s + 1) * _SUBLANES, :]
        return acc

    def kernel(x_ref, t_ref, o_ref):
        i = pl.program_id(0)
        zero = jnp.zeros((_SUBLANES, _LANES), jnp.float32)

        def block_partial(masked):
            if n_chunks == 1:
                f = chunk_loss(x_ref[...], t_ref[...], i * tile_rows, masked)
                return add_partial(f, zero)

            def body(k, acc):
                r0 = pl.multiple_of(k * chunk_rows, chunk_rows)
                f = chunk_loss(x_ref[pl.ds(r0, chunk_rows), :],
                               t_ref[pl.ds(r0, chunk_rows), :],
                               i * tile_rows + r0, masked)
                return add_partial(f, acc)

            return lax.fori_loop(0, n_chunks, body, zero)

        if last_ragged:
            @pl.when(i < num_blocks - 1)
            def _():
                o_ref[...] = block_partial(False)

            @pl.when(i == num_blocks - 1)
            def _():
                o_ref[...] = block_partial(True)
        else:
            o_ref[...] = block_partial(False)

    return kernel


def focal_loss(inputs, targets, *, tile_rows=4096, chunk_rows=256):
    """Mean binary focal loss over all elements (any shape; f32/bf16/int8 inputs ok)."""
    assert inputs.shape == targets.shape, "inputs/targets shapes must match"
    n_total = inputs.size
    x_flat = inputs.reshape(-1)
    t_flat = targets.reshape(-1)

    min_rows = max(_min_tile_rows(inputs.dtype), _min_tile_rows(targets.dtype))

    # Copy-pad ONLY when the flat length is not lane-aligned or smaller than one
    # minimal tile (x=1, t=1 padding contributes exactly zero loss).  Lane-aligned
    # arrays are streamed with zero extra HBM traffic (reshape is a bitcast).
    n_padded = max(_round_up(n_total, _LANES), min_rows * _LANES)
    if n_padded != n_total:
        pad = n_padded - n_total
        x_flat = jnp.pad(x_flat, (0, pad), constant_values=1)
        t_flat = jnp.pad(t_flat, (0, pad), constant_values=1)

    rows_total = n_padded // _LANES
    x2d = x_flat.reshape(rows_total, _LANES)
    t2d = t_flat.reshape(rows_total, _LANES)

    # Tile sizing: multiple of the dtype's sublane tile, never larger than the array.
    tile_rows = min(_round_up(tile_rows, min_rows),
                    (rows_total // min_rows) * min_rows)
    tile_rows = max(tile_rows, min_rows)
    if tile_rows % chunk_rows != 0:
        chunk_rows = tile_rows            # tiny / irregular tiles: single chunk

    num_blocks = pl.cdiv(rows_total, tile_rows)
    last_ragged = (rows_total % tile_rows) != 0

    kernel = _make_kernel(tile_rows, chunk_rows, rows_total, num_blocks, last_ragged)

    partials = pl.pallas_call(
        kernel,
        out_shape=jax.ShapeDtypeStruct((num_blocks * _SUBLANES, _LANES), jnp.float32),
        grid_spec=pltpu.PrefetchScalarGridSpec(
            num_scalar_prefetch=0,
            grid=(num_blocks,),
            in_specs=[
                pl.BlockSpec((tile_rows, _LANES), lambda i: (i, 0)),
                pl.BlockSpec((tile_rows, _LANES), lambda i: (i, 0)),
            ],
            out_specs=pl.BlockSpec((_SUBLANES, _LANES), lambda i: (i, 0)),
        ),
        compiler_params=pltpu.CompilerParams(
            # Independent blocks -> megacore / v7x dual-TensorCore friendly.
            dimension_semantics=("parallel",),
        ),
    )(x2d, t2d)

    total = jnp.sum(partials, dtype=jnp.float32)
    return (total / jnp.float32(n_total)).reshape(())


def _focal_loss_ref(inputs, targets):
    x = inputs.astype(jnp.float32)
    t = targets.astype(jnp.float32)
    log_p = jnp.maximum(jnp.log(x), LOG_CLAMP)
    log_1mp = jnp.maximum(jnp.log(1.0 - x), LOG_CLAMP)
    bce = -(t * log_p + (1.0 - t) * log_1mp)
    pt = jnp.exp(-bce)
    return jnp.mean(ALPHA * (1.0 - pt) ** GAMMA * bce)


if __name__ == "__main__":
    key = jax.random.PRNGKey(0)
    k1, k2, k3, k4, k5, k6 = jax.random.split(key, 6)

    # NCHW: batch=2, channels=4, spatial=16x16 (module default logits=False -> probs)
    shape = (2, 4, 16, 16)
    inputs = jax.nn.sigmoid(jax.random.normal(k1, shape, dtype=jnp.float32))
    targets = jax.random.bernoulli(k2, p=0.5, shape=shape).astype(jnp.float32)

    out = jax.block_until_ready(focal_loss(inputs, targets))
    ref = _focal_loss_ref(inputs, targets)
    assert jnp.allclose(out, ref, rtol=2e-5, atol=1e-6), (out, ref)

    # Non-128-divisible flat size exercises the (tiny) zero-loss padding path.
    shape2 = (2, 3, 7, 5)
    inputs2 = jax.nn.sigmoid(jax.random.normal(k3, shape2, dtype=jnp.float32))
    targets2 = jax.random.bernoulli(k4, p=0.5, shape=shape2).astype(jnp.float32)
    out2 = jax.block_until_ready(focal_loss(inputs2, targets2))
    ref2 = _focal_loss_ref(inputs2, targets2)
    assert jnp.allclose(out2, ref2, rtol=2e-5, atol=1e-6), (out2, ref2)

    # 128-aligned but not tile-aligned (15 rows, tile_rows=8): exercises the in-kernel
    # ragged-last-block masking path (no wrapper pad, no full-array copy).
    shape3 = (3, 5, 8, 16)
    inputs3 = jax.nn.sigmoid(jax.random.normal(k5, shape3, dtype=jnp.float32))
    targets3 = jax.random.bernoulli(k6, p=0.5, shape=shape3).astype(jnp.float32)
    out3 = jax.block_until_ready(focal_loss(inputs3, targets3, tile_rows=8))
    ref3 = _focal_loss_ref(inputs3, targets3)
    assert jnp.allclose(out3, ref3, rtol=2e-5, atol=1e-6), (out3, ref3)

    # bf16 activations stream narrow from HBM; upcast to f32 happens in-kernel.
    inputs4 = inputs.astype(jnp.bfloat16)
    out4 = jax.block_until_ready(focal_loss(inputs4, targets))
    ref4 = _focal_loss_ref(inputs4, targets)
    assert jnp.allclose(out4, ref4, rtol=2e-5, atol=1e-6), (out4, ref4)

    print("KERNEL_OK")
</pallas_src>

<mosaic_0001>
module attributes {stable_mosaic.version = 11 : i64} {
  func.func @kernel(%arg0: i32, %arg1: memref<16x128xf32, #tpu.memory_space<vmem>>, %arg2: memref<16x128xf32, #tpu.memory_space<vmem>>, %arg3: memref<8x128xf32, #tpu.memory_space<vmem>>) attributes {dimension_semantics = [#tpu.dimension_semantics<parallel>], iteration_bounds = array<i64: 1>, scalar_prefetch = 0 : i64, scratch_operands = 0 : i64, tpu.core_type = #tpu.core_type<tc>, window_params = [{transform_indices = @transform_0, window_bounds = array<i64: 16, 128>}, {transform_indices = @transform_1, window_bounds = array<i64: 16, 128>}, {transform_indices = @transform_2, window_bounds = array<i64: 8, 128>}]} {
    %cst = arith.constant 0.000000e+00 : f32
    %0 = vector.broadcast %cst : f32 to vector<8x128xf32>
    %c0 = arith.constant 0 : index
    %c0_0 = arith.constant 0 : index
    %1 = vector.load %arg1[%c0, %c0_0] : memref<16x128xf32, #tpu.memory_space<vmem>>, vector<16x128xf32>
    %c0_1 = arith.constant 0 : index
    %c0_2 = arith.constant 0 : index
    %2 = vector.load %arg2[%c0_1, %c0_2] : memref<16x128xf32, #tpu.memory_space<vmem>>, vector<16x128xf32>
    %3 = math.log %1 : vector<16x128xf32>
    %cst_3 = arith.constant -1.000000e+02 : f32
    %4 = vector.broadcast %cst_3 : f32 to vector<16x128xf32>
    %5 = arith.maximumf %3, %4 : vector<16x128xf32>
    %cst_4 = arith.constant 1.000000e+00 : f32
    %6 = vector.broadcast %cst_4 : f32 to vector<16x128xf32>
    %7 = arith.subf %6, %1 : vector<16x128xf32>
    %8 = math.log %7 : vector<16x128xf32>
    %cst_5 = arith.constant -1.000000e+02 : f32
    %9 = vector.broadcast %cst_5 : f32 to vector<16x128xf32>
    %10 = arith.maximumf %8, %9 : vector<16x128xf32>
    %11 = arith.mulf %2, %5 : vector<16x128xf32>
    %cst_6 = arith.constant 1.000000e+00 : f32
    %12 = vector.broadcast %cst_6 : f32 to vector<16x128xf32>
    %13 = arith.subf %12, %2 : vector<16x128xf32>
    %14 = arith.mulf %13, %10 : vector<16x128xf32>
    %15 = arith.addf %11, %14 : vector<16x128xf32>
    %cst_7 = arith.constant 0.000000e+00 : f32
    %16 = vector.broadcast %cst_7 : f32 to vector<16x128xf32>
    %17 = arith.subf %16, %15 : vector<16x128xf32>
    %cst_8 = arith.constant 0.000000e+00 : f32
    %18 = vector.broadcast %cst_8 : f32 to vector<16x128xf32>
    %19 = arith.subf %18, %17 : vector<16x128xf32>
    %20 = math.exp %19 : vector<16x128xf32>
    %cst_9 = arith.constant 1.000000e+00 : f32
    %21 = vector.broadcast %cst_9 : f32 to vector<16x128xf32>
    %22 = arith.subf %21, %20 : vector<16x128xf32>
    %23 = arith.mulf %22, %22 : vector<16x128xf32>
    %cst_10 = arith.constant 1.000000e+00 : f32
    %24 = vector.broadcast %cst_10 : f32 to vector<16x128xf32>
    %25 = arith.mulf %24, %23 : vector<16x128xf32>
    %26 = arith.mulf %25, %17 : vector<16x128xf32>
    %27 = vector.extract_strided_slice %26 {offsets = [0, 0], sizes = [8, 128], strides = [1, 1]} : vector<16x128xf32> to vector<8x128xf32>
    %28 = arith.addf %0, %27 : vector<8x128xf32>
    %29 = vector.extract_strided_slice %26 {offsets = [8, 0], sizes = [8, 128], strides = [1, 1]} : vector<16x128xf32> to vector<8x128xf32>
    %30 = arith.addf %28, %29 : vector<8x128xf32>
    %c0_11 = arith.constant 0 : index
    %c0_12 = arith.constant 0 : index
    %31 = vector.load %arg3[%c0_11, %c0_12] : memref<8x128xf32, #tpu.memory_space<vmem>>, vector<8x128xf32>
    tpu.vector_store %arg3[%c0_11, %c0_12], %30 {strides = array<i32>} : memref<8x128xf32, #tpu.memory_space<vmem>>, vector<8x128xf32>,
    return
  }
  func.func @transform_0(%arg0: i32) -> (i32, i32) {
    %c0_i32 = arith.constant 0 : i32
    %c0_i32_0 = arith.constant 0 : i32
    return %arg0, %c0_i32 : i32, i32
  }
  func.func @transform_1(%arg0: i32) -> (i32, i32) {
    %c0_i32 = arith.constant 0 : i32
    %c0_i32_0 = arith.constant 0 : i32
    return %arg0, %c0_i32 : i32, i32
  }
  func.func @transform_2(%arg0: i32) -> (i32, i32) {
    %c0_i32 = arith.constant 0 : i32
    %c0_i32_0 = arith.constant 0 : i32
    return %arg0, %c0_i32 : i32, i32
  }
}

</mosaic_0001>

<bundles_post_ra>
// kernel: tpu_custom_call.1
= control target key start
LH: loop header
LB: loop body
LE: loop exit
PB: predicated region body
PF: predicated region fallthrough
CT: control target
= control target key end

     0   :  { %7 = vsyncpa [#allocation3], 0  ;;  %s229_s0 = inlined_call_operand.hbm [shape: f32[16,128], index: 0, kind: input, shape index: {}]   ;;  %s230_s1 = inlined_call_operand.hbm [shape: f32[16,128], index: 1, kind: input, shape index: {}]   ;;  %s231_s2 = inlined_call_operand.hbm [shape: f32[8,128], index: 2, kind: output, shape index: {}]  }
   0x1   :  { %8 = vsyncpa [#allocation6], 0 }
   0x2   :  { %9 = vsyncpa [#allocation4], 0  ;;  %s14_s11 = sshll.u32 %s229_s0, 4  ;;  %s200_s12 = smov [#allocation2]   ;;  %s15_s11 = int_to_ptr.hbm [resolvable:$true] %s14_s11 }
   0x3   :  { %s16_s13 = sshll.u32 %s200_s12, 4  ;;  %s27_s16 = sshll.u32 %s230_s1, 4  ;;  %s17_s13 = int_to_ptr.vmem [resolvable:$true] %s16_s13  ;;  %s28_s16 = int_to_ptr.hbm [resolvable:$true] %s27_s16 }
   0x4   :  { %s201_s17 = smov 128   ;;  %s202_s18 = smov 8  }
   0x5   :  { %22 = dma.hbm_to_vmem [thread:$0]  %s15_s11, 256, %s17_s13, [#allocation3], %s201_s17, %s201_s17, %s202_s18  }
   0x6   :  { %s203_s19 = smov [#allocation5]  }
   0x7   :  { %s29_s20 = sshll.u32 %s203_s19, 4  ;;  %s30_s20 = int_to_ptr.vmem [resolvable:$true] %s29_s20 }
   0x8   :  { %35 = dma.hbm_to_vmem [thread:$0]  %s28_s16, 256, %s30_s20, [#allocation6], %s201_s17, %s201_s17, %s202_s18  }
   0x9   :  { %194 = dma.done.wait [#allocation3], 256  }
   0xa   :  { %195 = vsyncadd [#allocation3], 4294967040 }
   0xb   :  { %196 = dma.done.wait [#allocation6], 256  }
   0xc   :  { %197 = vsyncadd [#allocation6], 4294967040  ;;  %v44_v0 = vld [vmem:[#allocation2] sm:$0xff]  ;;  %v45_v1 = vld [vmem:[#allocation2 + $0x8] sm:$0xff]  ;;  %s204_s0 = smov [#allocation7]   ;;  %s94_s23 = sshll.u32 %s231_s2, 4  ;;  %s95_s23 = int_to_ptr.hbm [resolvable:$true] %s94_s23 }
   0xd   :  { %110 = vlog2.f32 %v44_v0  ;;  %v54_v2 = vsub.f32 1.0, %v44_v0  ;;  %v55_v3 = vsub.f32 1.0, %v45_v1  ;;  %v46_v5 = vld [vmem:[#allocation5] sm:$0xff]  ;;  %v47_v7 = vld [vmem:[#allocation5 + $0x8] sm:$0xff]  ;;  %s92_s1 = sshll.u32 %s204_s0, 4  ;;  %s93_s1 = int_to_ptr.vmem [resolvable:$true] %s92_s1 }
   0xe   :  { %112 = vlog2.f32 %v45_v1  ;;  %v64_v14 = vsub.f32 1.0, %v46_v5  ;;  %v65_v17 = vsub.f32 1.0, %v47_v7 }
   0xf   :  { %114 = vlog2.f32 %v54_v2 }
  0x10   :  { %116 = vlog2.f32 %v55_v3 }
  0x13   :  { %v111_v4 = vpop.eup %110 }
  0x14   :  { %v113_v6 = vpop.eup %112  ;;  %v49_v8 = vmul.f32 0.6931472, %v111_v4 }
  0x15   :  { %v115_v9 = vpop.eup %114  ;;  %v51_v10 = vmul.f32 0.6931472, %v113_v6 }
  0x16   :  { %v117_v11 = vpop.eup %116  ;;  %v52_v12 = vmax.f32 %v49_v8, -100.0  ;;  %v57_v13 = vmul.f32 0.6931472, %v115_v9 }
  0x17   :  { %v53_v15 = vmax.f32 %v51_v10, -100.0  ;;  %v59_v16 = vmul.f32 0.6931472, %v117_v11 }
  0x18   :  { %v60_v18 = vmax.f32 %v57_v13, -100.0  ;;  %v62_v19 = vmul.f32 %v52_v12, %v46_v5 }
  0x19   :  { %v61_v20 = vmax.f32 %v59_v16, -100.0  ;;  %v63_v21 = vmul.f32 %v53_v15, %v47_v7 }
  0x1a   :  { %v66_v22 = vmul.f32 %v64_v14, %v60_v18 }
  0x1b   :  { %v67_v23 = vmul.f32 %v65_v17, %v61_v20 }
  0x1c   :  { %v68_v24 = vadd.f32 %v66_v22, %v62_v19 }
  0x1d   :  { %v69_v25 = vadd.f32 %v67_v23, %v63_v21 }
  0x1e   :  { %v70_v26 = vsub.f32 0.0, %v68_v24 }
  0x1f   :  { %v71_v27 = vsub.f32 0.0, %v69_v25 }
  0x20   :  { %v72_v28 = vsub.f32 0.0, %v70_v26 }
  0x21   :  { %v73_v29 = vsub.f32 0.0, %v71_v27 }
  0x22   :  { %v74_v30 = vmul.f32 1.442695, %v72_v28 }
  0x23   :  { %v76_v31 = vmul.f32 1.442695, %v73_v29 }
  0x24   :  { %118 = vpow2.f32 %v74_v30 }
  0x25   :  { %120 = vpow2.f32 %v76_v31 }
  0x2a   :  { %v119_v32 = vpop.eup %118 }
  0x2b   :  { %v121_v33 = vpop.eup %120  ;;  %v78_v34 = vsub.f32 1.0, %v119_v32 }
  0x2c   :  { %v79_v35 = vsub.f32 1.0, %v121_v33 }
  0x2d   :  { %v80_v36 = vmul.f32 %v78_v34, %v78_v34 }
  0x2e   :  { %v81_v37 = vmul.f32 %v79_v35, %v79_v35 }
  0x2f   :  { %v82_v38 = vmul.f32 %v80_v36, %v70_v26 }
  0x30   :  { %v83_v39 = vmul.f32 %v81_v37, %v71_v27 }
  0x32   :  { %v85_v40 = vadd.f32 %v83_v39, %v82_v38 }
  0x34   :  { %86 = vst [vmem:[#allocation7] sm:$0xff] %v85_v40 }
  0x35   :  { %97 = dma.vmem_to_hbm [thread:$0]  %s93_s1, 128, %s95_s23, [#allocation4]  }
  0x36   :  { %198 = dma.done.wait [#allocation4], 128  }
  0x37   :  { %199 = vsyncadd [#allocation4], 4294967168 }
  0x38   :  { %102 = vsyncpa [#allocation3], 1 }
  0x39   :  { %103 = vsyncpa [#allocation6], 1 }
  0x3a   :  { %104 = vsyncpa [#allocation4], 1 }

</bundles_post_ra>
